<compile_context>
chip_gen: v7x
topology: tpu7x:2x2x1
jax: 0.10.0
libtpu: 0.0.40
codegen_flags: <defaults>
</compile_context>

<pallas_src>
import jax
import jax.numpy as jnp
from jax.experimental import pallas as pl
from jax.experimental.pallas import tpu as pltpu

_MIB = 1024 * 1024


def _softplus_f32(x):
    # Matches torch.nn.functional.softplus(beta=1, threshold=20):
    # x where x > 20, else log1p(exp(x)).  The discarded exp branch is either
    # huge-but-finite or inf that the where() drops — never NaN.
    x = x.astype(jnp.float32)
    return jnp.where(x > 20.0, x, jnp.log1p(jnp.exp(x)))


def _netg_onelayer_sp_kernel(inp_ref, w_ref, out_ref, w_sp_ref):
    # Grid = (j over L2 tiles, i over N tiles); i is innermost and sequential.
    # The weight tile only changes when j changes and the inner index restarts
    # at 0 for every new j, so softplus is computed once per weight tile here.
    @pl.when(pl.program_id(1) == 0)
    def _():
        w_sp_ref[...] = _softplus_f32(w_ref[...]).astype(w_sp_ref.dtype)

    out_ref[...] = jnp.dot(
        inp_ref[...], w_sp_ref[...], preferred_element_type=jnp.float32
    ).astype(out_ref.dtype)


def _round_up(x, m):
    return (x + m - 1) // m * m


def _divisor_tiles(total, mult, cap):
    """Descending divisors of `total` that are multiples of `mult` and <= cap."""
    cap = max(mult, min(total, cap))
    out = [t for t in range(mult, cap + 1, mult) if total % t == 0]
    out.sort(reverse=True)
    return out or [mult]


def _scoped_vmem_cap():
    phys = 64 * _MIB  # conservative fallback (v7x per-core VMEM)
    try:
        phys = int(pltpu.get_tpu_info().vmem_capacity_bytes)
    except Exception:
        phys = 64 * _MIB
    # v5e/v6e (128 MiB physical) -> 96 MiB scoped; v7x (64 MiB) -> 48 MiB scoped.
    return max(48 * _MIB, (phys * 3) // 4)


def netg_onelayer_sp_forward(inp, l1, *, use_bf16=True, tm_cap=1024, tn_cap=2048):
    """Pallas implementation of netG_onelayer_sp.forward.

    inp: (N, L1) float32
    l1 : (L1, L2) float32 raw parameter; softplus is applied inside the kernel.
    returns (N, L2) float32
    """
    N, L1 = inp.shape
    L1w, L2 = l1.shape
    assert L1 == L1w, "inner dims must match"

    in_dtype = jnp.bfloat16 if use_bf16 else jnp.float32
    in_bytes = 2 if use_bf16 else 4
    sp_bytes = in_bytes

    # --- Padding (minimal, lane-aware) -----------------------------------
    # L1 is the lane dim of the inp block and the MXU contraction dim -> 128.
    # L2 is the lane dim of weight/output -> 128.  N is sublane -> 8.
    l1p = _round_up(L1, 128)
    l2p = _round_up(L2, 128)
    n_p = _round_up(N, 8)

    # --- VMEM-aware, divisor-based tile selection -------------------------
    scoped_cap = _scoped_vmem_cap()
    tile_budget = scoped_cap - 8 * _MIB

    eff_tn_cap = tn_cap
    if l2p >= 256:
        # Keep >=2 L2 tiles so the "parallel" axis can shard across v7x's 2 TCs.
        eff_tn_cap = min(eff_tn_cap, l2p // 2)
    tn_cands = _divisor_tiles(l2p, 128, eff_tn_cap)
    tm_cands = _divisor_tiles(n_p, 8, tm_cap)

    def vmem_need(tm, tn):
        return (2 * tm * l1p * in_bytes     # inp blocks (double-buffered)
                + 2 * l1p * tn * 4          # raw f32 weight blocks (double-buffered)
                + 2 * tm * tn * 4           # f32 output blocks (double-buffered)
                + l1p * tn * sp_bytes)      # resident softplus(weight) scratch

    min_good_tm = min(tm_cands[0], 128)
    chosen = None
    fallback = None
    for tn_c in tn_cands:  # largest TN first: fewer repeated inp reads from HBM
        tm_fit = next((t for t in tm_cands if vmem_need(t, tn_c) <= tile_budget), None)
        if tm_fit is None:
            continue
        if fallback is None:
            fallback = (tn_c, tm_fit)
        if tm_fit >= min_good_tm:
            chosen = (tn_c, tm_fit)
            break
    if chosen is None:
        chosen = fallback if fallback is not None else (tn_cands[-1], tm_cands[-1])
    tn, tm = chosen
    # TODO(synk): if even the smallest tiles blow the budget (very large L1),
    # add a trailing "arbitrary" K grid axis with an f32 accumulator scratch.

    # --- Input staging: a single pad+cast pass, only when needed ----------
    if (n_p, l1p) != (N, L1):
        # Zero padding of the L1 columns is required for exactness; padded N
        # rows only produce extra output rows that are sliced off below.
        inp_p = jnp.zeros((n_p, l1p), in_dtype).at[:N, :L1].set(inp.astype(in_dtype))
    elif inp.dtype != in_dtype:
        inp_p = inp.astype(in_dtype)
    else:
        inp_p = inp

    if (l1p, l2p) != (L1, L2):
        # Padded weight rows meet zero inp columns (contribute 0); padded weight
        # columns produce garbage output columns that are sliced off below.
        l1_p = jnp.zeros((l1p, l2p), l1.dtype).at[:L1, :L2].set(l1)
    else:
        l1_p = l1

    grid = (l2p // tn, n_p // tm)  # (j over L2 tiles, i over N tiles)
    need = vmem_need(tm, tn)
    vmem_limit = int(min(scoped_cap, max(need + 8 * _MIB, 32 * _MIB)))

    out_p = pl.pallas_call(
        _netg_onelayer_sp_kernel,
        out_shape=jax.ShapeDtypeStruct((n_p, l2p), jnp.float32),
        grid_spec=pltpu.PrefetchScalarGridSpec(
            num_scalar_prefetch=0,
            grid=grid,
            in_specs=[
                # inp tile depends only on i (the N tile).
                pl.BlockSpec((tm, l1p), lambda j, i: (i, 0)),
                # weight tile depends only on j -> stays resident over the i loop.
                # TODO(synk): pipeline_mode=pl.Buffered(1) here would reclaim the
                # second hidden weight buffer (it changes only once per N sweep).
                pl.BlockSpec((l1p, tn), lambda j, i: (0, j)),
            ],
            out_specs=pl.BlockSpec((tm, tn), lambda j, i: (i, j)),
            # softplus'd weight tile, computed once per j.
            scratch_shapes=[pltpu.VMEM((l1p, tn), in_dtype)],
        ),
        compiler_params=pltpu.CompilerParams(
            dimension_semantics=("parallel", "arbitrary"),
            vmem_limit_bytes=vmem_limit,
        ),
        cost_estimate=pl.CostEstimate(
            flops=2 * n_p * l1p * l2p,
            transcendentals=2 * l1p * l2p,  # exp + log1p per weight element
            bytes_accessed=(l2p // tn) * n_p * l1p * in_bytes  # inp re-streamed per j
            + l1p * l2p * 4                                     # weight read once
            + n_p * l2p * 4,                                    # output written once
        ),
    )(inp_p, l1_p)

    return out_p[:N, :L2]


# ---------------------------------------------------------------------------
# References & tests
# ---------------------------------------------------------------------------
def _ref_f32(inp, l1):
    return jnp.dot(inp, jax.nn.softplus(l1))


def _ref_bf16(inp, l1):
    # Same numerics as the bf16 kernel path: f32 softplus, bf16 operands,
    # f32 accumulation.
    return jnp.dot(
        inp.astype(jnp.bfloat16),
        jax.nn.softplus(l1).astype(jnp.bfloat16),
        preferred_element_type=jnp.float32,
    )


def _run_case(name, key, N, L1, L2, f32_atol, f32_rtol):
    k_w, k_inp = jax.random.split(key)
    l1_param = 0.1 * jax.random.normal(k_w, (L1, L2), dtype=jnp.float32)
    inp = jax.random.normal(k_inp, (N, L1), dtype=jnp.float32)

    # f32 path (matches PyTorch numerics)
    out_f32 = jax.block_until_ready(
        netg_onelayer_sp_forward(inp, l1_param, use_bf16=False)
    )
    assert out_f32.shape == (N, L2), f"{name}: wrong shape (f32)"
    assert jnp.allclose(out_f32, _ref_f32(inp, l1_param), atol=f32_atol, rtol=f32_rtol), (
        f"{name}: f32 mismatch"
    )

    # bf16 MXU path (default)
    out_bf16 = jax.block_until_ready(netg_onelayer_sp_forward(inp, l1_param))
    assert out_bf16.shape == (N, L2), f"{name}: wrong shape (bf16)"
    assert jnp.allclose(out_bf16, _ref_bf16(inp, l1_param), atol=1e-2, rtol=1e-2), (
        f"{name}: bf16 mismatch"
    )


if __name__ == "__main__":
    key = jax.random.PRNGKey(0)
    k_a, k_b, k_c = jax.random.split(key, 3)

    # Small config matching the module's synthetic scale (N=8, L1=32, L2=64).
    _run_case("small", k_a, N=8, L1=32, L2=64, f32_atol=1e-4, f32_rtol=1e-5)

    # Ragged shapes: exercises L1/L2/N padding, divisor tile selection, and
    # the >=2 parallel L2 tiles rule.
    _run_case("ragged", k_b, N=300, L1=48, L2=200, f32_atol=1e-4, f32_rtol=1e-5)

    # Multi-tile in both grid axes: exercises the per-j softplus scratch cache
    # being reused across the inner N loop and re-initialized per L2 tile.
    _run_case("tiled", k_c, N=2048, L1=384, L2=512, f32_atol=1e-3, f32_rtol=1e-4)

    print("KERNEL_OK")
</pallas_src>

<mosaic_0001>
module attributes {stable_mosaic.version = 11 : i64} {
  func.func @_netg_onelayer_sp_kernel(%arg0: i32, %arg1: i32, %arg2: memref<8x128xf32, #tpu.memory_space<vmem>>, %arg3: memref<128x128xf32, #tpu.memory_space<vmem>>, %arg4: memref<8x128xf32, #tpu.memory_space<vmem>>, %arg5: memref<128x128xf32, #tpu.memory_space<vmem>>) attributes {dimension_semantics = [#tpu.dimension_semantics<parallel>, #tpu.dimension_semantics<arbitrary>], iteration_bounds = array<i64: 1, 1>, scalar_prefetch = 0 : i64, scratch_operands = 1 : i64, tpu.core_type = #tpu.core_type<tc>, window_params = [{transform_indices = @transform_0, window_bounds = array<i64: 8, 128>}, {transform_indices = @transform_1, window_bounds = array<i64: 128, 128>}, {transform_indices = @transform_2, window_bounds = array<i64: 8, 128>}]} {
    %c0_i32 = arith.constant 0 : i32
    %0 = arith.cmpi eq, %arg1, %c0_i32 : i32
    %1 = arith.extui %0 : i1 to i32
    %c0_i32_0 = arith.constant 0 : i32
    %2 = arith.cmpi ne, %1, %c0_i32_0 : i32
    scf.if %2 {
      %c0_6 = arith.constant 0 : index
      %c0_7 = arith.constant 0 : index
      %7 = vector.load %arg3[%c0_6, %c0_7] : memref<128x128xf32, #tpu.memory_space<vmem>>, vector<128x128xf32>
      %cst_8 = arith.constant 2.000000e+01 : f32
      %8 = vector.broadcast %cst_8 : f32 to vector<128x128xf32>
      %9 = arith.cmpf ogt, %7, %8 : vector<128x128xf32>
      %10 = math.exp %7 : vector<128x128xf32>
      %11 = math.log1p %10 : vector<128x128xf32>
      %12 = arith.select %9, %7, %11 : vector<128x128xi1>, vector<128x128xf32>
      %c0_9 = arith.constant 0 : index
      %c0_10 = arith.constant 0 : index
      %13 = vector.load %arg5[%c0_9, %c0_10] : memref<128x128xf32, #tpu.memory_space<vmem>>, vector<128x128xf32>
      tpu.vector_store %arg5[%c0_9, %c0_10], %12 {strides = array<i32>} : memref<128x128xf32, #tpu.memory_space<vmem>>, vector<128x128xf32>,
    } else {
    }
    %c0 = arith.constant 0 : index
    %c0_1 = arith.constant 0 : index
    %3 = vector.load %arg2[%c0, %c0_1] : memref<8x128xf32, #tpu.memory_space<vmem>>, vector<8x128xf32>
    %c0_2 = arith.constant 0 : index
    %c0_3 = arith.constant 0 : index
    %4 = vector.load %arg5[%c0_2, %c0_3] : memref<128x128xf32, #tpu.memory_space<vmem>>, vector<128x128xf32>
    %cst = arith.constant dense<0.000000e+00> : vector<8x128xf32>
    %5 = tpu.matmul %3, %4, %cst {dimension_numbers = #tpu.dot_dimension_numbers<[1], [0], [0], [1], [0, 0, 1, 1], [], []>} : vector<8x128xf32>, vector<128x128xf32>, vector<8x128xf32> -> vector<8x128xf32>
    %c0_4 = arith.constant 0 : index
    %c0_5 = arith.constant 0 : index
    %6 = vector.load %arg4[%c0_4, %c0_5] : memref<8x128xf32, #tpu.memory_space<vmem>>, vector<8x128xf32>
    tpu.vector_store %arg4[%c0_4, %c0_5], %5 {strides = array<i32>} : memref<8x128xf32, #tpu.memory_space<vmem>>, vector<8x128xf32>,
    return
  }
  func.func @transform_0(%arg0: i32, %arg1: i32) -> (i32, i32) {
    %c0_i32 = arith.constant 0 : i32
    %c0_i32_0 = arith.constant 0 : i32
    return %arg1, %c0_i32 : i32, i32
  }
  func.func @transform_1(%arg0: i32, %arg1: i32) -> (i32, i32) {
    %c0_i32 = arith.constant 0 : i32
    %c0_i32_0 = arith.constant 0 : i32
    return %c0_i32, %arg0 : i32, i32
  }
  func.func @transform_2(%arg0: i32, %arg1: i32) -> (i32, i32) {
    %c0_i32 = arith.constant 0 : i32
    return %arg1, %arg0 : i32, i32
  }
}

</mosaic_0001>

<bundles_post_ra>
// kernel: tpu_custom_call.1
= control target key start
LH: loop header
LB: loop body
LE: loop exit
PB: predicated region body
PF: predicated region fallthrough
CT: control target
= control target key end

     0   :  { %7 = vsyncpa [#allocation4], 0  ;;  %s892_s0 = inlined_call_operand.hbm [shape: f32[8,128], index: 0, kind: input, shape index: {}]   ;;  %s893_s1 = inlined_call_operand.hbm [shape: f32[128,128], index: 1, kind: input, shape index: {}]   ;;  %s894_s2 = inlined_call_operand.hbm [shape: f32[8,128], index: 2, kind: output, shape index: {}]  }
   0x1   :  { %8 = vsyncpa [#allocation7], 0 }
   0x2   :  { %9 = vsyncpa [#allocation5], 0  ;;  %s606_s9 = smov [#allocation3]   ;;  %s607_s11 = smov [#allocation6]  }
   0x3   :  { %s16_s10 = sshll.u32 %s606_s9, 4  ;;  %s25_s12 = sshll.u32 %s607_s11, 4  ;;  %s17_s10 = int_to_ptr.vmem [resolvable:$true] %s16_s10  ;;  %s629_s12 = int_to_ptr.vmem [resolvable:$true] %s25_s12 }
   0x4   :  { %s534_s15 = scalar_lea.hbm %s892_s0, 128 }
   0x5   :  { %p535_p0 = scmp.ne.s32.totalorder %s892_s0, %s534_s15  ;;  %p538_p1 = scmp.lt.u32.totalorder %s534_s15, %s892_s0 }
   0x7   :  { %p540_p2 = pnand %p538_p1, %p535_p0 }
   0x9   :  { %543 = shalt.err (!%p540_p2)
}
   0xa   :  { %s544_s20 = scalar_lea.vmem %s17_s10, 128  ;;  %p549_p4 = scmp.lt.s32.totalorder %s17_s10, %s17_s10 }
   0xb   :  { %p545_p3 = scmp.ne.s32.totalorder %s17_s10, %s544_s20  ;;  %p550_p5 = scmp.lt.s32.totalorder %s544_s20, %s544_s20 }
   0xd   :  { %p551_p6 = por %p550_p5, %p549_p4 }
   0xf   :  { %p552_p7 = pnand %p551_p6, %p545_p3 }
  0x11   :  { %555 = shalt.err (!%p552_p7)
}
  0x12   :  { %19 = dma.hbm_to_vmem [thread:$0]  %s892_s0, 128, %s17_s10, [#allocation4]  }
  0x13   :  { %s556_s25 = scalar_lea.hbm %s893_s1, 2048 }
  0x14   :  { %p557_p8 = scmp.ne.s32.totalorder %s893_s1, %s556_s25  ;;  %p560_p9 = scmp.lt.u32.totalorder %s556_s25, %s893_s1 }
  0x16   :  { %p562_p10 = pnand %p560_p9, %p557_p8 }
  0x18   :  { %565 = shalt.err (!%p562_p10)
}
  0x19   :  { %s566_s30 = scalar_lea.vmem %s629_s12, 2048  ;;  %p571_p12 = scmp.lt.s32.totalorder %s629_s12, %s629_s12 }
  0x1a   :  { %p567_p11 = scmp.ne.s32.totalorder %s629_s12, %s566_s30  ;;  %p572_p13 = scmp.lt.s32.totalorder %s566_s30, %s566_s30 }
  0x1c   :  { %p573_p0 = por %p572_p13, %p571_p12 }
  0x1e   :  { %p574_p1 = pnand %p573_p0, %p567_p11 }
  0x20   :  { %577 = shalt.err (!%p574_p1)
}
  0x21   :  { %s608_s0 = smov 128   ;;  %s609_s3 = smov 8  }
  0x22   :  { %31 = dma.hbm_to_vmem [thread:$0]  %s893_s1, 2048, %s629_s12, [#allocation7], %s608_s0, %s608_s0, %s609_s3  }
  0x23   :  { %600 = dma.done.wait [#allocation4], 128  }
  0x24   :  { %601 = vsyncadd [#allocation4], 4294967168 }
  0x25   :  { %602 = dma.done.wait [#allocation7], 2048  }
  0x26   :  { %603 = vsyncadd [#allocation7], 4294965248  ;;  %v610_v0 = vmov 0.0|0.0   ;;  %vm611_vm0 = vmmov 0   ;;  %v612_v1 = vmov 0.0   ;;  %v661_v2 = vld [vmem:[#allocation6] sm:$0xff] }
  0x27   :  { %438 = vmatprep.subr.bf16.mxu0 %v610_v0  ;;  %435 = vmatprep.mubr.msk.f32.mxu0 %vm611_vm0, %v612_v1  ;;  %v663_v3 = vld [vmem:[#allocation6 + $0x8] sm:$0xff]  ;;  %v665_v4 = vld [vmem:[#allocation6 + $0x10] sm:$0xff]  ;;  %v74_v5 = vmul.f32 1.442695, %v661_v2  ;;  %v669_v7 = vld [vmem:[#allocation6 + $0x18] sm:$0xff]  ;;  %vm58_vm1 = vcmp.gt.f32.partialorder %v661_v2, 20.0 }
  0x28   :  { %v76_v6 = vmul.f32 1.442695, %v663_v3  ;;  %v78_v8 = vmul.f32 1.442695, %v665_v4  ;;  %v672_v9 = vld [vmem:[#allocation6 + $0x20] sm:$0xff]  ;;  %v674_v10 = vld [vmem:[#allocation6 + $0x28] sm:$0xff] }
  0x29   :  { %470 = vpow2.f32 %v74_v5  ;;  %v80_v11 = vmul.f32 1.442695, %v669_v7  ;;  %v677_v12 = vld [vmem:[#allocation6 + $0x30] sm:$0xff]  ;;  %v679_v13 = vld [vmem:[#allocation6 + $0x38] sm:$0xff]  ;;  %v82_v14 = vmul.f32 1.442695, %v672_v9 }
  0x2a   :  { %472 = vpow2.f32 %v76_v6  ;;  %v84_v15 = vmul.f32 1.442695, %v674_v10  ;;  %v683_v16 = vld [vmem:[#allocation6 + $0x40] sm:$0xff]  ;;  %v86_v17 = vmul.f32 1.442695, %v677_v12  ;;  %v686_v18 = vld [vmem:[#allocation6 + $0x48] sm:$0xff] }
  0x2b   :  { %474 = vpow2.f32 %v78_v8  ;;  %v88_v19 = vmul.f32 1.442695, %v679_v13  ;;  %v689_v20 = vld [vmem:[#allocation6 + $0x50] sm:$0xff]  ;;  %v90_v21 = vmul.f32 1.442695, %v683_v16  ;;  %v692_v22 = vld [vmem:[#allocation6 + $0x58] sm:$0xff] }
  0x2c   :  { %476 = vpow2.f32 %v80_v11  ;;  %v92_v23 = vmul.f32 1.442695, %v686_v18  ;;  %v695_v24 = vld [vmem:[#allocation6 + $0x60] sm:$0xff]  ;;  %v94_v25 = vmul.f32 1.442695, %v689_v20  ;;  %v700_v32 = vld [vmem:[#allocation6 + $0x68] sm:$0xff] }
  0x2d   :  { %478 = vpow2.f32 %v82_v14  ;;  %v96_v26 = vmul.f32 1.442695, %v692_v22  ;;  %v98_v27 = vmul.f32 1.442695, %v695_v24  ;;  %v702_v37 = vld [vmem:[#allocation6 + $0x70] sm:$0xff]  ;;  %vm59_vm3 = vcmp.gt.f32.partialorder %v663_v3, 20.0 }
  0x2e   :  { %480 = vpow2.f32 %v84_v15  ;;  %v705_v42 = vmul.f32 1.442695, %v700_v32  ;;  %v708_v46 = vmul.f32 1.442695, %v702_v37  ;;  %vm60_vm4 = vcmp.gt.f32.partialorder %v665_v4, 20.0  ;;  %s613_s1 = smov [#allocation8]  }
  0x2f   :  { %482 = vpow2.f32 %v86_v17  ;;  %vm61_vm6 = vcmp.gt.f32.partialorder %v669_v7, 20.0  ;;  %vm62_vm8 = vcmp.gt.f32.partialorder %v672_v9, 20.0  ;;  %vm63_vm11 = vcmp.gt.f32.partialorder %v674_v10, 20.0  ;;  %s376_s6 = sshll.u32 %s613_s1, 4  ;;  %s377_s6 = int_to_ptr.vmem [resolvable:$true] %s376_s6 }
  0x30   :  { %484 = vpow2.f32 %v88_v19  ;;  %vm64_vm13 = vcmp.gt.f32.partialorder %v677_v12, 20.0  ;;  %vm65_vm14 = vcmp.gt.f32.partialorder %v679_v13, 20.0  ;;  %s578_s7 = scalar_lea.vmem %s377_s6, 128  ;;  %p583_p3 = scmp.lt.s32.totalorder %s377_s6, %s377_s6 }
  0x31   :  { %486 = vpow2.f32 %v90_v21  ;;  %p579_p2 = scmp.ne.s32.totalorder %s377_s6, %s578_s7  ;;  %p584_p4 = scmp.lt.s32.totalorder %s578_s7, %s578_s7 }
  0x32   :  { %488 = vpow2.f32 %v92_v23 }
  0x33   :  { %v471_v28 = vpop.eup %470  ;;  %490 = vpow2.f32 %v94_v25  ;;  %p585_p5 = por %p584_p4, %p583_p3 }
  0x34   :  { %v473_v29 = vpop.eup %472  ;;  %v106_v30 = vadd.f32 1.0, %v471_v28  ;;  %v109_v31 = vmul.f32 -0.5, %v471_v28  ;;  %492 = vpow2.f32 %v96_v26  ;;  %v112_v34 = vand.u32 2147483647, %v471_v28 }
  0x35   :  { %v475_v33 = vpop.eup %474  ;;  %v115_v35 = vadd.f32 1.0, %v473_v29  ;;  %v118_v36 = vmul.f32 -0.5, %v473_v29  ;;  %494 = vpow2.f32 %v98_v27  ;;  %v121_v44 = vand.u32 2147483647, %v473_v29  ;;  %p586_p6 = pnand %p585_p5, %p579_p2 }
  0x36   :  { %v477_v38 = vpop.eup %476  ;;  %496 = vlog2.f32 %v106_v30  ;;  %v124_v39 = vadd.f32 1.0, %v475_v33  ;;  %v127_v41 = vmul.f32 -0.5, %v475_v33  ;;  %v110_v48 = vadd.f32 1.0, %v109_v31 }
  0x37   :  { %v479_v40 = vpop.eup %478  ;;  %498 = vlog2.f32 %v115_v35  ;;  %v133_v45 = vadd.f32 1.0, %v477_v38  ;;  %vm713_vm2 = vcmp.lt.f32.partialorder %v112_v34, 0.0004427343  ;;  %v119_v50 = vadd.f32 1.0, %v118_v36 }
  0x38   :  { %v481_v43 = vpop.eup %480  ;;  %500 = vlog2.f32 %v124_v39  ;;  %v136_v51 = vmul.f32 -0.5, %v477_v38  ;;  %v130_v53 = vand.u32 2147483647, %v475_v33  ;;  %v142_v54 = vadd.f32 1.0, %v479_v40 }
  0x39   :  { %v710_v47 = vpop.eup %482  ;;  %502 = vlog2.f32 %v133_v45  ;;  %v145_v55 = vmul.f32 -0.5, %v479_v40  ;;  %v128_v57 = vadd.f32 1.0, %v127_v41  ;;  %v139_v59 = vand.u32 2147483647, %v477_v38 }
  0x3a   :  { %v717_v52 = vpop.eup %484  ;;  %v137_v58 = vadd.f32 1.0, %v136_v51  ;;  %v148_v60 = vand.u32 2147483647, %v479_v40  ;;  %504 = vlog2.f32 %v142_v54  ;;  %v151_v63 = vadd.f32 1.0, %v481_v43 }
  0x3b   :  { %v720_v56 = vpop.eup %486  ;;  %v146_v62 = vadd.f32 1.0, %v145_v55  ;;  %v154_v1 = vmul.f32 -0.5, %v481_v43  ;;  %v111_v6 = vmul.f32 %v471_v28, %v110_v48  ;;  %v120_v8 = vmul.f32 %v473_v29, %v119_v50 }
  0x3c   :  { %v723_v61 = vpop.eup %488  ;;  %vm727_vm5 = vcmp.lt.f32.partialorder %v121_v44, 0.0004427343  ;;  %v160_v14 = vadd.f32 1.0, %v710_v47  ;;  %vm735_vm7 = vcmp.lt.f32.partialorder %v130_v53, 0.0004427343  ;;  %506 = vlog2.f32 %v151_v63 }
  0x3d   :  { %v725_v5 = vpop.eup %490  ;;  %v155_v19 = vadd.f32 1.0, %v154_v1  ;;  %v157_v21 = vand.u32 2147483647, %v481_v43  ;;  %v129_v25 = vmul.f32 %v475_v33, %v128_v57  ;;  %v163_v26 = vmul.f32 -0.5, %v710_v47 }
  0x3e   :  { %v733_v15 = vpop.eup %492  ;;  %508 = vlog2.f32 %v160_v14  ;;  %v169_v27 = vadd.f32 1.0, %v717_v52  ;;  %v138_v29 = vmul.f32 %v477_v38, %v137_v58  ;;  %vm744_vm9 = vcmp.lt.f32.partialorder %v139_v59, 0.0004427343 }
  0x3f   :  { %v739_v23 = vpop.eup %494  ;;  %v147_v31 = vmul.f32 %v479_v40, %v146_v62  ;;  %vm748_vm10 = vcmp.lt.f32.partialorder %v148_v60, 0.0004427343  ;;  %v166_v36 = vand.u32 2147483647, %v710_v47  ;;  %v178_v39 = vadd.f32 1.0, %v720_v56 }
  0x40   :  { %v497_v28 = vpop.eup %496  ;;  %510 = vlog2.f32 %v169_v27  ;;  %v156_v44 = vmul.f32 %v481_v43, %v155_v19  ;;  %vm755_vm12 = vcmp.lt.f32.partialorder %v157_v21, 0.0004427343  ;;  %v172_v40 = vmul.f32 -0.5, %v717_v52 }
  0x41   :  { %v499_v35 = vpop.eup %498  ;;  %v108_v33 = vmul.f32 0.6931472, %v497_v28  ;;  %v164_v51 = vadd.f32 1.0, %v163_v26  ;;  %512 = vlog2.f32 %v178_v39  ;;  %v175_v55 = vand.u32 2147483647, %v717_v52 }
  0x42   :  { %v501_v41 = vpop.eup %500  ;;  %v117_v38 = vmul.f32 0.6931472, %v499_v35  ;;  %v181_v57 = vmul.f32 -0.5, %v720_v56  ;;  %vm776_vm15 = vcmp.lt.f32.partialorder %v166_v36, 0.0004427343  ;;  %v173_v1 = vadd.f32 1.0, %v172_v40 }
  0x43   :  { %v114_v48 = vsel %vm713_vm2, %v111_v6, %v108_v33  ;;  %v126_v50 = vmul.f32 0.6931472, %v501_v41  ;;  %v503_v53 = vpop.eup %502  ;;  %v187_v6 = vadd.f32 1.0, %v723_v61  ;;  %v165_v11 = vmul.f32 %v710_v47, %v164_v51 }
  0x44   :  { %v123_v54 = vsel %vm727_vm5, %v120_v8, %v117_v38  ;;  %v250_v43 = vsel %vm58_vm1, %v661_v2, %v114_v48  ;;  %v135_v59 = vmul.f32 0.6931472, %v503_v53  ;;  %v505_v62 = vpop.eup %504  ;;  %v184_v14 = vand.u32 2147483647, %v720_v56 }
  0x45   :  { %v251_v49 = vsel %vm59_vm3, %v663_v3, %v123_v54  ;;  %v132_v58 = vsel %vm735_vm7, %v129_v25, %v126_v50  ;;  %v144_v8 = vmul.f32 0.6931472, %v505_v62  ;;  %v182_v21 = vadd.f32 1.0, %v181_v57  ;;  %v822_v50 = vld [vmem:[#allocation6 + $0x78] sm:$0xff] }
  0x46   :  { %v439_v2 = vpack.c.bf16 %v251_v49, %v250_v43  ;;  %v252_v63 = vsel %vm60_vm4, %v665_v4, %v132_v58  ;;  %v141_v3 = vsel %vm744_vm9, %v138_v29, %v135_v59  ;;  %v507_v17 = vpop.eup %506  ;;  %514 = vlog2.f32 %v187_v6 }
  0x47   :  { %v253_v19 = vsel %vm61_vm6, %v669_v7, %v141_v3  ;;  %v196_v4 = vadd.f32 1.0, %v725_v5  ;;  %v150_v27 = vsel %vm748_vm10, %v147_v31, %v144_v8  ;;  %v153_v47 = vmul.f32 0.6931472, %v507_v17 }
  0x48   :  { %440 = vmatpush3.bf16.msra.mxu0 %v439_v2  ;;  %v509_v25 = vpop.eup %508  ;;  %v442_v26 = vpack.c.bf16 %v253_v19, %v252_v63  ;;  %v190_v28 = vmul.f32 -0.5, %v723_v61  ;;  %v254_v29 = vsel %vm62_vm8, %v672_v9, %v150_v27  ;;  %v174_v7 = vmul.f32 %v717_v52, %v173_v1 }
  0x49   :  { %441 = vmatprep.subr.bf16.mxu0 %v610_v0  ;;  %v162_v30 = vmul.f32 0.6931472, %v509_v25  ;;  %516 = vlog2.f32 %v196_v4  ;;  %v159_v33 = vsel %vm755_vm12, %v156_v44, %v153_v47  ;;  %vm802_vm0 = vcmp.lt.f32.partialorder %v175_v55, 0.0004427343 }
  0x4a   :  { %v511_v35 = vpop.eup %510  ;;  %vm806_vm1 = vcmp.lt.f32.partialorder %v184_v14, 0.0004427343  ;;  %v199_v34 = vmul.f32 -0.5, %v725_v5  ;;  %v255_v9 = vsel %vm63_vm11, %v674_v10, %v159_v33  ;;  %v205_v41 = vadd.f32 1.0, %v733_v15 }
  0x4b   :  { %v168_v52 = vsel %vm776_vm15, %v165_v11, %v162_v30  ;;  %v171_v39 = vmul.f32 0.6931472, %v511_v35  ;;  %v513_v38 = vpop.eup %512  ;;  %v445_v44 = vpack.c.bf16 %v255_v9, %v254_v29  ;;  %v183_v40 = vmul.f32 %v720_v56, %v182_v21 }
  0x4c   :  { %443 = vmatpush3.bf16.msra.mxu0 %v442_v26  ;;  %v256_v45 = vsel %vm64_vm13, %v677_v12, %v168_v52  ;;  %v191_v48 = vadd.f32 1.0, %v190_v28  ;;  %v180_v51 = vmul.f32 0.6931472, %v513_v38  ;;  %v193_v53 = vand.u32 2147483647, %v723_v61 }
  0x4d   :  { %444 = vmatprep.subr.bf16.mxu0 %v610_v0  ;;  %v177_v10 = vsel %vm802_vm0, %v174_v7, %v171_v39  ;;  %518 = vlog2.f32 %v205_v41  ;;  %v200_v43 = vadd.f32 1.0, %v199_v34  ;;  %v208_v55 = vmul.f32 -0.5, %v733_v15 }
  0x4e   :  { %v257_v54 = vsel %vm65_vm14, %v679_v13, %v177_v10  ;;  %520 = vpow2.f32 %v705_v42  ;;  %v202_v56 = vand.u32 2147483647, %v725_v5  ;;  %v214_v57 = vadd.f32 1.0, %v739_v23 }
  0x4f   :  { %v448_v12 = vpack.c.bf16 %v257_v54, %v256_v45  ;;  %v104_v49 = vmul.f32 1.442695, %v822_v50  ;;  %vm66_vm2 = vcmp.gt.f32.partialorder %v683_v16, 20.0  ;;  %v186_v13 = vsel %vm806_vm1, %v183_v40, %v180_v51 }
  0x50   :  { %446 = vmatpush3.bf16.msra.mxu0 %v445_v44  ;;  %v192_v58 = vmul.f32 %v723_v61, %v191_v48  ;;  %v515_v59 = vpop.eup %514  ;;  %vm67_vm3 = vcmp.gt.f32.partialorder %v686_v18, 20.0  ;;  %vm841_vm4 = vcmp.lt.f32.partialorder %v193_v53, 0.0004427343  ;;  %522 = vlog2.f32 %v214_v57 }
  0x51   :  { %447 = vmatprep.subr.bf16.mxu0 %v610_v0  ;;  %v189_v60 = vmul.f32 0.6931472, %v515_v59  ;;  %v201_v62 = vmul.f32 %v725_v5, %v200_v43  ;;  %v209_v2 = vadd.f32 1.0, %v208_v55  ;;  %524 = vpow2.f32 %v708_v46  ;;  %v282_v59 = vld [vmem:[#allocation3] sm:$0xff] }
  0x52   :  { %v258_v1 = vsel %vm66_vm2, %v683_v16, %v186_v13  ;;  %vm848_vm5 = vcmp.lt.f32.partialorder %v202_v56, 0.0004427343  ;;  %v211_v6 = vand.u32 2147483647, %v733_v15  ;;  %526 = vpow2.f32 %v104_v49 }
  0x53   :  { %v517_v63 = vpop.eup %516  ;;  %v195_v3 = vsel %vm841_vm4, %v192_v58, %v189_v60  ;;  %vm68_vm6 = vcmp.gt.f32.partialorder %v689_v20, 20.0  ;;  %v210_v11 = vmul.f32 %v733_v15, %v209_v2  ;;  %v217_v17 = vmul.f32 -0.5, %v739_v23 }
  0x54   :  { %449 = vmatpush3.bf16.msra.mxu0 %v448_v12  ;;  %v198_v5 = vmul.f32 0.6931472, %v517_v63  ;;  %v259_v46 = vsel %vm67_vm3, %v686_v18, %v195_v3  ;;  %vm212_vm7 = vcmp.lt.f32.partialorder %v211_v6, 0.0004427343  ;;  %vm69_vm8 = vcmp.gt.f32.partialorder %v692_v22, 20.0 }
  0x55   :  { %450 = vmatprep.subr.bf16.mxu0 %v610_v0  ;;  %v451_v8 = vpack.c.bf16 %v259_v46, %v258_v1  ;;  %v218_v47 = vadd.f32 1.0, %v217_v17  ;;  %v220_v7 = vand.u32 2147483647, %v739_v23  ;;  %vm70_vm10 = vcmp.gt.f32.partialorder %v695_v24, 20.0 }
  0x56   :  { %v204_v16 = vsel %vm848_vm5, %v201_v62, %v198_v5  ;;  %vm71_vm12 = vcmp.gt.f32.partialorder %v700_v32, 20.0  ;;  %vm72_vm14 = vcmp.gt.f32.partialorder %v702_v37, 20.0  ;;  %vm73_vm0 = vcmp.gt.f32.partialorder %v822_v50, 20.0 }
  0x57   :  { %v519_v14 = vpop.eup %518  ;;  %v260_v18 = vsel %vm68_vm6, %v689_v20, %v204_v16  ;;  %v219_v20 = vmul.f32 %v739_v23, %v218_v47  ;;  %vm221_vm9 = vcmp.lt.f32.partialorder %v220_v7, 0.0004427343 }
  0x58   :  { %v521_v19 = vpop.eup %520  ;;  %452 = vmatpush3.bf16.msra.mxu0 %v451_v8  ;;  %v207_v21 = vmul.f32 0.6931472, %v519_v14 }
  0x59   :  { %453 = vmatprep.subr.bf16.mxu0 %v610_v0  ;;  %v223_v4 = vadd.f32 1.0, %v521_v19  ;;  %v226_v29 = vmul.f32 -0.5, %v521_v19 }
  0x5a   :  { %v213_v25 = vsel %vm212_vm7, %v210_v11, %v207_v21  ;;  %v523_v26 = vpop.eup %522 }
  0x5b   :  { %v261_v27 = vsel %vm69_vm8, %v692_v22, %v213_v25  ;;  %528 = vlog2.f32 %v223_v4  ;;  %v525_v15 = vpop.eup %524  ;;  %v216_v36 = vmul.f32 0.6931472, %v523_v26  ;;  %v227_v31 = vadd.f32 1.0, %v226_v29 }
  0x5c   :  { %v454_v28 = vpack.c.bf16 %v261_v27, %v260_v18  ;;  %v527_v30 = vpop.eup %526  ;;  %v232_v35 = vadd.f32 1.0, %v525_v15  ;;  %v235_v34 = vmul.f32 -0.5, %v525_v15  ;;  %v229_v22 = vand.u32 2147483647, %v521_v19 }
  0x5d   :  { %v241_v33 = vadd.f32 1.0, %v527_v30  ;;  %v244_v9 = vmul.f32 -0.5, %v527_v30  ;;  %v222_v52 = vsel %vm221_vm9, %v219_v20, %v216_v36  ;;  %v228_v39 = vmul.f32 %v521_v19, %v227_v31 }
  0x5e   :  { %455 = vmatpush3.bf16.msra.mxu0 %v454_v28  ;;  %530 = vlog2.f32 %v232_v35  ;;  %v236_v41 = vadd.f32 1.0, %v235_v34  ;;  %vm230_vm11 = vcmp.lt.f32.partialorder %v229_v22, 0.0004427343  ;;  %v238_v44 = vand.u32 2147483647, %v525_v15 }
  0x5f   :  { %456 = vmatprep.subr.bf16.mxu0 %v610_v0  ;;  %532 = vlog2.f32 %v241_v33  ;;  %v245_v45 = vadd.f32 1.0, %v244_v9  ;;  %v247_v40 = vand.u32 2147483647, %v527_v30  ;;  %v262_v48 = vsel %vm70_vm10, %v695_v24, %v222_v52 }
  0x60   :  { %v237_v51 = vmul.f32 %v525_v15, %v236_v41  ;;  %vm239_vm13 = vcmp.lt.f32.partialorder %v238_v44, 0.0004427343 }
  0x61   :  { %v246_v43 = vmul.f32 %v527_v30, %v245_v45  ;;  %vm248_vm15 = vcmp.lt.f32.partialorder %v247_v40, 0.0004427343 }
  0x65   :  { %v529_v38 = vpop.eup %528 }
  0x66   :  { %v225_v23 = vmul.f32 0.6931472, %v529_v38 }
  0x68   :  { %v231_v10 = vsel %vm230_vm11, %v228_v39, %v225_v23  ;;  %v531_v53 = vpop.eup %530 }
  0x69   :  { %v263_v54 = vsel %vm71_vm12, %v700_v32, %v231_v10  ;;  %v533_v55 = vpop.eup %532  ;;  %v234_v56 = vmul.f32 0.6931472, %v531_v53 }
  0x6a   :  { %v457_v12 = vpack.c.bf16 %v263_v54, %v262_v48  ;;  %v243_v57 = vmul.f32 0.6931472, %v533_v55 }
  0x6b   :  { %v240_v49 = vsel %vm239_vm13, %v237_v51, %v234_v56 }
  0x6c   :  { %458 = vmatpush3.bf16.msra.mxu0 %v457_v12  ;;  %v249_v24 = vsel %vm248_vm15, %v246_v43, %v243_v57  ;;  %v264_v13 = vsel %vm72_vm14, %v702_v37, %v240_v49 }
  0x6d   :  { %459 = vmatprep.subr.bf16.mxu0 %v610_v0  ;;  %v265_v32 = vsel %vm73_vm0, %v822_v50, %v249_v24 }
  0x6e   :  { %v460_v58 = vpack.c.bf16 %v265_v32, %v264_v13 }
  0x70   :  { %461 = vmatpush3.bf16.msra.mxu0 %v460_v58 }
  0x73   :  { %436 = vmatmul.mubr.f32.vlgmr.msra.gmra.mrb[0].mxu0 %v282_v59 }
 0x146   :  { %v365_v42 = vpop.f32.mrb[0].mxu0 }
 0x147   :  { %369 = vst [vmem:[#allocation8] sm:$0xff] %v365_v42  ;;  %v437_v60 = vpop.f32.mrb[1].mxu0 }
 0x148   :  { %589 = shalt.err (!%p586_p6)
}
 0x149   :  { %s590_s10 = scalar_lea.hbm %s894_s2, 128 }
 0x14a   :  { %p591_p7 = scmp.ne.s32.totalorder %s894_s2, %s590_s10  ;;  %p594_p8 = scmp.lt.u32.totalorder %s590_s10, %s894_s2 }
 0x14c   :  { %p596_p9 = pnand %p594_p8, %p591_p7 }
 0x14e   :  { %599 = shalt.err (!%p596_p9)
}
 0x14f   :  { %379 = dma.vmem_to_hbm [thread:$0]  %s377_s6, 128, %s894_s2, [#allocation5]  }
 0x150   :  { %604 = dma.done.wait [#allocation5], 128  }
 0x151   :  { %605 = vsyncadd [#allocation5], 4294967168 }
 0x152   :  { %383 = vsyncpa [#allocation4], 1 }
 0x153   :  { %384 = vsyncpa [#allocation7], 1 }
 0x154   :  { %385 = vsyncpa [#allocation5], 1 }

</bundles_post_ra>
